<compile_context>
chip_gen: v7x
topology: tpu7x:2x2x1
jax: 0.10.0
libtpu: 0.0.40
codegen_flags: <defaults>
</compile_context>

<pallas_src>
import numpy as np
import jax
import jax.numpy as jnp
from jax import lax
from jax.experimental import pallas as pl
from jax.experimental.pallas import tpu as pltpu

_LANE = 128              # vreg lane width
_ACC_SUB = 8             # f32 accumulator sublane group
_SUB_CHUNK_ROWS = 512    # rows per inner accumulation step (256 KiB f32)
_MAX_TILE_ROWS = 8192    # 8192 x 128 x 4 B = 4 MiB per f32 tile


def _round_up(x, m):
    return ((x + m - 1) // m) * m


def _cdiv(a, b):
    return -(-a // b)


def _sublane_align(dtype):
    # Native packed sublane count: f32 -> 8, bf16/f16 -> 16, int8/fp8 -> 32.
    return max(_ACC_SUB, 32 // jnp.dtype(dtype).itemsize)


def _make_kernel(tile_rows, sub_chunk, num_tiles, valid_rows):
    """Build the sum-of-squares kernel with all tiling params static."""
    assert tile_rows % sub_chunk == 0 and sub_chunk % _ACC_SUB == 0
    n_sub = tile_rows // sub_chunk
    last_tile_valid = valid_rows - (num_tiles - 1) * tile_rows
    ragged = last_tile_valid != tile_rows

    def _chunk_sumsq(x, row_offset, masked):
        # x: (sub_chunk, LANE) slice in the input dtype.
        x = x.astype(jnp.float32)
        if masked:
            row = lax.broadcasted_iota(jnp.int32, (sub_chunk, _LANE), 0) + row_offset
            x = jnp.where(row < last_tile_valid, x, 0.0)
        sq = x * x
        # Fold the sub_chunk rows into sublane groups (pure VPU adds).
        return jnp.sum(sq.reshape(sub_chunk // _ACC_SUB, _ACC_SUB, _LANE), axis=0)

    def _tile_sumsq(x_ref, masked):
        if n_sub == 1:
            return _chunk_sumsq(x_ref[...], 0, masked)

        def body(c, acc):
            r0 = pl.multiple_of(c * sub_chunk, sub_chunk)
            return acc + _chunk_sumsq(x_ref[pl.ds(r0, sub_chunk), :],
                                      c * sub_chunk, masked)

        return lax.fori_loop(0, n_sub, body,
                             jnp.zeros((_ACC_SUB, _LANE), jnp.float32),
                             unroll=min(4, n_sub))

    def kernel(x_ref, part_ref):
        # x_ref:    (tile_rows, 128) VMEM tile of the flattened prediction
        # part_ref: (1, 8, 128) per-tile partial sum of squares (f32)
        if not ragged:
            part_ref[0] = _tile_sumsq(x_ref, False)
        else:
            i = pl.program_id(0)

            @pl.when(i < num_tiles - 1)
            def _():
                part_ref[0] = _tile_sumsq(x_ref, False)

            @pl.when(i == num_tiles - 1)
            def _():
                part_ref[0] = _tile_sumsq(x_ref, True)

    return kernel


def sigma_loss(pred):
    """Pallas implementation of Sigma_loss.forward: mean(pred**2) * 0.01 * 1e-6."""
    total = int(np.prod(pred.shape))
    flat = pred.reshape(-1)                       # free (contiguous bitcast)
    sub_align = _sublane_align(pred.dtype)

    # Tiny-input fallback: below one aligned (sublane x 128) slab the pallas
    # launch/pipeline overhead dominates and a fused XLA reduce wins.
    if total < sub_align * _LANE:
        x = flat.astype(jnp.float32)
        return jnp.sum(x * x) / total * 0.01 * 1e-6

    # Lane-dense 2-D view. The reshape is free when total divides 128.
    if total % _LANE:
        # TODO(synk): a manual-DMA (memory_space=pl.ANY) path could avoid this
        # copy for lane-unaligned totals; real heatmap shapes divide by 128.
        flat = jnp.pad(flat, (0, _LANE - total % _LANE))  # zeros: exact for sum-of-squares
    rows = flat.shape[0] // _LANE
    x2d = flat.reshape(rows, _LANE)

    # Tile selection: big tiles to amortize per-grid-step overhead, at least
    # two grid steps for medium inputs (v7x megacore), sub-chunked inner loop
    # so no tile-sized f32 temporaries are materialized.
    sub_chunk = min(_SUB_CHUNK_ROWS, _round_up(rows, sub_align))
    target = max(sub_chunk, _round_up(_cdiv(rows, 2), sub_chunk))
    tile_rows = min(_MAX_TILE_ROWS, target)
    num_tiles = _cdiv(rows, tile_rows)

    kernel = _make_kernel(tile_rows, sub_chunk, num_tiles, rows)

    partials = pl.pallas_call(
        kernel,
        out_shape=jax.ShapeDtypeStruct((num_tiles, _ACC_SUB, _LANE), jnp.float32),
        grid=(num_tiles,),
        in_specs=[pl.BlockSpec((tile_rows, _LANE), lambda i: (i, 0))],
        out_specs=pl.BlockSpec((1, _ACC_SUB, _LANE), lambda i: (i, 0, 0)),
        compiler_params=pltpu.CompilerParams(
            dimension_semantics=("parallel",),
            vmem_limit_bytes=32 * 1024 * 1024),
    )(x2d)

    # Final reduction / mean / scaling on the tiny partials array in plain JAX.
    return jnp.sum(partials) / total * 0.01 * 1e-6


def _reference(pred):
    return jnp.mean(jnp.square(pred.astype(jnp.float32))) * 0.01 * 1e-6


if __name__ == "__main__":
    key = jax.random.PRNGKey(0)

    # Small shape consistent with the module's usage (heatmap-like tensor).
    pred = jax.random.normal(key, (2, 4, 16, 16), dtype=jnp.float32)
    loss = jax.block_until_ready(sigma_loss(pred))
    ref = jax.block_until_ready(_reference(pred))
    np.testing.assert_allclose(np.asarray(loss), np.asarray(ref),
                               rtol=1e-5, atol=1e-12)

    # Medium shape: exercises multi-tile, in-kernel ragged-tile masking and the
    # fori_loop sub-chunk accumulation paths.
    pred2 = jax.random.normal(jax.random.PRNGKey(1), (3, 25, 64, 64),
                              dtype=jnp.float32)
    loss2 = jax.block_until_ready(sigma_loss(pred2))
    ref2 = jax.block_until_ready(_reference(pred2))
    np.testing.assert_allclose(np.asarray(loss2), np.asarray(ref2),
                               rtol=1e-5, atol=1e-12)

    print("KERNEL_OK")
</pallas_src>

<mosaic_0001>
module attributes {stable_mosaic.version = 11 : i64} {
  func.func @kernel(%arg0: i32, %arg1: memref<16x128xf32, #tpu.memory_space<vmem>>, %arg2: memref<1x8x128xf32, #tpu.memory_space<vmem>>) attributes {dimension_semantics = [#tpu.dimension_semantics<parallel>], iteration_bounds = array<i64: 1>, scalar_prefetch = 0 : i64, scratch_operands = 0 : i64, tpu.core_type = #tpu.core_type<tc>, window_params = [{transform_indices = @transform_0, window_bounds = array<i64: 16, 128>}, {transform_indices = @transform_1, window_bounds = array<i64: 1, 8, 128>}]} {
    %c0 = arith.constant 0 : index
    %c0_0 = arith.constant 0 : index
    %0 = vector.load %arg1[%c0, %c0_0] : memref<16x128xf32, #tpu.memory_space<vmem>>, vector<16x128xf32>
    %1 = arith.mulf %0, %0 : vector<16x128xf32>
    %2 = vector.shape_cast %1 : vector<16x128xf32> to vector<2x8x128xf32>
    %cst = arith.constant dense<0.000000e+00> : vector<8x128xf32>
    %3 = vector.multi_reduction <add>, %2, %cst [0] : vector<2x8x128xf32> to vector<8x128xf32>
    %c0_1 = arith.constant 0 : index
    %c0_2 = arith.constant 0 : index
    %c0_3 = arith.constant 0 : index
    %4 = vector.load %arg2[%c0_1, %c0_2, %c0_3] : memref<1x8x128xf32, #tpu.memory_space<vmem>>, vector<1x8x128xf32>
    %5 = vector.shape_cast %4 : vector<1x8x128xf32> to vector<8x128xf32>
    %6 = vector.shape_cast %3 : vector<8x128xf32> to vector<1x8x128xf32>
    tpu.vector_store %arg2[%c0_1, %c0_2, %c0_3], %6 {strides = array<i32>} : memref<1x8x128xf32, #tpu.memory_space<vmem>>, vector<1x8x128xf32>,
    return
  }
  func.func @transform_0(%arg0: i32) -> (i32, i32) {
    %c0_i32 = arith.constant 0 : i32
    %c0_i32_0 = arith.constant 0 : i32
    return %arg0, %c0_i32 : i32, i32
  }
  func.func @transform_1(%arg0: i32) -> (i32, i32, i32) {
    %c0_i32 = arith.constant 0 : i32
    %c0_i32_0 = arith.constant 0 : i32
    %c0_i32_1 = arith.constant 0 : i32
    return %arg0, %c0_i32, %c0_i32_0 : i32, i32, i32
  }
}

</mosaic_0001>

<bundles_post_ra>
// kernel: tpu_custom_call.1
= control target key start
LH: loop header
LB: loop body
LE: loop exit
PB: predicated region body
PF: predicated region fallthrough
CT: control target
= control target key end

     0   :  { %6 = vsyncpa [#allocation3], 0  ;;  %s134_s0 = inlined_call_operand.hbm [shape: f32[16,128], index: 0, kind: input, shape index: {}]   ;;  %s135_s1 = inlined_call_operand.hbm [shape: f32[1,8,128], index: 1, kind: output, shape index: {}]  }
   0x1   :  { %7 = vsyncpa [#allocation4], 0  ;;  %s96_s6 = smov [#allocation2]   ;;  %s48_s10 = scalar_lea.hbm %s134_s0, 256 }
   0x2   :  { %s13_s7 = sshll.u32 %s96_s6, 4  ;;  %p49_p0 = scmp.ne.s32.totalorder %s134_s0, %s48_s10  ;;  %s14_s7 = int_to_ptr.vmem [resolvable:$true] %s13_s7 }
   0x3   :  { %p52_p1 = scmp.lt.u32.totalorder %s48_s10, %s134_s0 }
   0x5   :  { %p54_p2 = pnand %p52_p1, %p49_p0 }
   0x7   :  { %57 = shalt.err (!%p54_p2)
}
   0x8   :  { %s58_s15 = scalar_lea.vmem %s14_s7, 256  ;;  %p63_p4 = scmp.lt.s32.totalorder %s14_s7, %s14_s7 }
   0x9   :  { %p59_p3 = scmp.ne.s32.totalorder %s14_s7, %s58_s15  ;;  %p64_p5 = scmp.lt.s32.totalorder %s58_s15, %s58_s15 }
   0xb   :  { %p65_p6 = por %p64_p5, %p63_p4 }
   0xd   :  { %p66_p7 = pnand %p65_p6, %p59_p3 }
   0xf   :  { %69 = shalt.err (!%p66_p7)
}
  0x10   :  { %s97_s16 = smov 128   ;;  %s98_s17 = smov 8  }
  0x11   :  { %19 = dma.hbm_to_vmem [thread:$0]  %s134_s0, 256, %s14_s7, [#allocation3], %s97_s16, %s97_s16, %s98_s17  }
  0x12   :  { %92 = dma.done.wait [#allocation3], 256  }
  0x13   :  { %93 = vsyncadd [#allocation3], 4294967040  ;;  %v23_v0 = vld [vmem:[#allocation2] sm:$0xff]  ;;  %v24_v1 = vld [vmem:[#allocation2 + $0x8] sm:$0xff]  ;;  %s99_s20 = smov [#allocation5]  }
  0x14   :  { %s35_s21 = sshll.u32 %s99_s20, 4  ;;  %v25_v2 = vmul.f32 %v23_v0, %v23_v0  ;;  %v26_v3 = vmul.f32 %v24_v1, %v24_v1  ;;  %s36_s21 = int_to_ptr.vmem [resolvable:$true] %s35_s21 }
  0x15   :  { %s70_s22 = scalar_lea.vmem %s36_s21, 128  ;;  %p75_p9 = scmp.lt.s32.totalorder %s36_s21, %s36_s21 }
  0x16   :  { %v27_v4 = vadd.f32 %v26_v3, %v25_v2  ;;  %p71_p8 = scmp.ne.s32.totalorder %s36_s21, %s70_s22  ;;  %p76_p10 = scmp.lt.s32.totalorder %s70_s22, %s70_s22 }
  0x18   :  { %28 = vst [vmem:[#allocation5] sm:$0xff] %v27_v4  ;;  %p77_p11 = por %p76_p10, %p75_p9 }
  0x1a   :  { %p78_p12 = pnand %p77_p11, %p71_p8 }
  0x1c   :  { %81 = shalt.err (!%p78_p12)
}
  0x1d   :  { %s82_s24 = scalar_lea.hbm %s135_s1, 128 }
  0x1e   :  { %p83_p13 = scmp.ne.s32.totalorder %s135_s1, %s82_s24  ;;  %p86_p0 = scmp.lt.u32.totalorder %s82_s24, %s135_s1 }
  0x20   :  { %p88_p1 = pnand %p86_p0, %p83_p13 }
  0x22   :  { %91 = shalt.err (!%p88_p1)
}
  0x23   :  { %38 = dma.vmem_to_hbm [thread:$0]  %s36_s21, 128, %s135_s1, [#allocation4]  }
  0x24   :  { %94 = dma.done.wait [#allocation4], 128  }
  0x25   :  { %95 = vsyncadd [#allocation4], 4294967168 }
  0x26   :  { %42 = vsyncpa [#allocation3], 1 }
  0x27   :  { %43 = vsyncpa [#allocation4], 1 }

</bundles_post_ra>
